<compile_context>
chip_gen: v7x
topology: tpu7x:2x2x1
jax: 0.10.0
libtpu: 0.0.40
codegen_flags: <defaults>
</compile_context>

<pallas_src>
import functools

import jax
import jax.numpy as jnp
from jax.experimental import pallas as pl
from jax.experimental.pallas import tpu as pltpu

# ---------------------------------------------------------------------------
# Model dimensions (from Deconstructor.__init__) and their lane-padded versions
# ---------------------------------------------------------------------------
D_IN, D_H1, D_H2, D_H3, D_OUT = 360, 250, 180, 100, 60
D_IN_P, D_H1_P, D_H2_P, D_H3_P, D_OUT_P = 384, 256, 256, 128, 128

SOFTPLUS_BETA = 3.0
SOFTPLUS_THRESHOLD = 20.0  # PyTorch nn.Softplus default threshold

TB_MAX = 512  # max batch-tile rows (>= 256 to fill the MXU M dimension)


def _round_up(n, m):
    return ((n + m - 1) // m) * m


def _softplus_beta(x):
    # PyTorch: softplus(x) = (1/beta) * log(1 + exp(beta*x)); identity when
    # beta*x > threshold. Overflow-free form (no inf in the dead branch).
    bx = SOFTPLUS_BETA * x
    sp = (jnp.maximum(bx, 0.0) + jnp.log1p(jnp.exp(-jnp.abs(bx)))) / SOFTPLUS_BETA
    return jnp.where(bx > SOFTPLUS_THRESHOLD, x, sp)


# ---------------------------------------------------------------------------
# Pallas kernel: full forward pass fused (4 matmuls + activations) on one
# batch tile. Weights/biases are resident (same block every grid step).
# ---------------------------------------------------------------------------
def deconstructor_kernel(x_ref,
                         w1_ref, b1_ref,
                         w2_ref, b2_ref,
                         w3_ref, b3_ref,
                         w4_ref, b4_ref,
                         out_ref):
    x = x_ref[...]  # bf16 (TB, 384)

    h = jnp.dot(x, w1_ref[...], preferred_element_type=jnp.float32) + b1_ref[...]
    h = _softplus_beta(h)

    h = jnp.dot(h.astype(jnp.bfloat16), w2_ref[...],
                preferred_element_type=jnp.float32) + b2_ref[...]
    h = jnp.tanh(h)

    h = jnp.dot(h.astype(jnp.bfloat16), w3_ref[...],
                preferred_element_type=jnp.float32) + b3_ref[...]
    h = jnp.tanh(h)

    pred = jnp.dot(h.astype(jnp.bfloat16), w4_ref[...],
                   preferred_element_type=jnp.float32) + b4_ref[...]
    out_ref[...] = pred.astype(out_ref.dtype)


# ---------------------------------------------------------------------------
# Wrapper: pad batch + features, launch a 1-D batch grid, slice result back.
# ---------------------------------------------------------------------------
@functools.partial(jax.jit, static_argnames=())
def deconstructor_forward(x, padded_params):
    """x: (B, 360) float32. padded_params: dict of lane-padded bf16 W / f32 b.
    Returns (B, 60) float32."""
    B = x.shape[0]
    tb = min(TB_MAX, _round_up(B, 8))     # batch tile (sublane-aligned)
    Bp = _round_up(B, tb)                 # padded batch
    grid = (Bp // tb,)

    # Pad input once: zero rows for batch padding, zero cols for feature padding.
    xp = jnp.pad(x.astype(jnp.bfloat16), ((0, Bp - B), (0, D_IN_P - D_IN)))

    p = padded_params
    w1, b1 = p["w1"], p["b1"]
    w2, b2 = p["w2"], p["b2"]
    w3, b3 = p["w3"], p["b3"]
    w4, b4 = p["w4"], p["b4"]

    def resident(shape):
        # Weights/biases: same block every grid step -> stay pinned in VMEM.
        return pl.BlockSpec(shape, lambda i: (0,) * len(shape))

    out_p = pl.pallas_call(
        deconstructor_kernel,
        out_shape=jax.ShapeDtypeStruct((Bp, D_OUT_P), jnp.float32),
        grid=grid,
        in_specs=[
            pl.BlockSpec((tb, D_IN_P), lambda i: (i, 0)),
            resident(w1.shape), resident(b1.shape),
            resident(w2.shape), resident(b2.shape),
            resident(w3.shape), resident(b3.shape),
            resident(w4.shape), resident(b4.shape),
        ],
        out_specs=pl.BlockSpec((tb, D_OUT_P), lambda i: (i, 0)),
        compiler_params=pltpu.CompilerParams(
            dimension_semantics=("parallel",),   # v7x: shard batch tiles over 2 TCs
            vmem_limit_bytes=16 << 20,
        ),
    )(xp, w1, b1, w2, b2, w3, b3, w4, b4)

    return out_p[:B, :D_OUT]


# ---------------------------------------------------------------------------
# Parameter init (mimics nn.Linear default U(-1/sqrt(fan_in), +)) + padding.
# Weights stored (in_features, out_features) -> forward is x @ W + b.
# ---------------------------------------------------------------------------
def init_params(key):
    dims = [(D_IN, D_H1), (D_H1, D_H2), (D_H2, D_H3), (D_H3, D_OUT)]
    params = {}
    for i, (fan_in, fan_out) in enumerate(dims, start=1):
        key, kw, kb = jax.random.split(key, 3)
        bound = 1.0 / jnp.sqrt(float(fan_in))
        params[f"w{i}"] = jax.random.uniform(
            kw, (fan_in, fan_out), jnp.float32, -bound, bound)
        params[f"b{i}"] = jax.random.uniform(
            kb, (1, fan_out), jnp.float32, -bound, bound)
    return params


def pad_params(params):
    """Zero-pad to lane-aligned shapes; weights -> bf16, biases stay f32."""
    pad_dims = [(D_IN_P, D_H1_P), (D_H1_P, D_H2_P),
                (D_H2_P, D_H3_P), (D_H3_P, D_OUT_P)]
    padded = {}
    for i, (ip, op) in enumerate(pad_dims, start=1):
        w = params[f"w{i}"]
        b = params[f"b{i}"]
        padded[f"w{i}"] = jnp.pad(
            w, ((0, ip - w.shape[0]), (0, op - w.shape[1]))).astype(jnp.bfloat16)
        padded[f"b{i}"] = jnp.pad(b, ((0, 0), (0, op - b.shape[1])))
    return padded


# ---------------------------------------------------------------------------
# Reference in plain JAX (same bf16-matmul / f32-accumulate recipe, unpadded)
# ---------------------------------------------------------------------------
def deconstructor_ref(x, p):
    def lin(a, w, b):
        return jnp.dot(a.astype(jnp.bfloat16), w.astype(jnp.bfloat16),
                       preferred_element_type=jnp.float32) + b
    h = _softplus_beta(lin(x, p["w1"], p["b1"]))
    h = jnp.tanh(lin(h, p["w2"], p["b2"]))
    h = jnp.tanh(lin(h, p["w3"], p["b3"]))
    return lin(h, p["w4"], p["b4"])


if __name__ == "__main__":
    key = jax.random.PRNGKey(0)
    key, kx = jax.random.split(key)

    B = 8  # small demo batch
    x = jax.random.normal(kx, (B, D_IN), jnp.float32)

    params = init_params(key)
    pparams = pad_params(params)

    out = deconstructor_forward(x, pparams)
    out = jax.block_until_ready(out)

    ref = deconstructor_ref(x, params)
    assert out.shape == (B, D_OUT), out.shape
    max_err = jnp.max(jnp.abs(out - ref))
    assert jnp.allclose(out, ref, atol=2e-3, rtol=2e-3), f"max abs err {max_err}"

    print("KERNEL_OK")
</pallas_src>

<mosaic_0001>
module attributes {stable_mosaic.version = 11 : i64} {
  func.func @deconstructor_kernel(%arg0: i32, %arg1: memref<8x384xbf16, #tpu.memory_space<vmem>>, %arg2: memref<384x256xbf16, #tpu.memory_space<vmem>>, %arg3: memref<1x256xf32, #tpu.memory_space<vmem>>, %arg4: memref<256x256xbf16, #tpu.memory_space<vmem>>, %arg5: memref<1x256xf32, #tpu.memory_space<vmem>>, %arg6: memref<256x128xbf16, #tpu.memory_space<vmem>>, %arg7: memref<1x128xf32, #tpu.memory_space<vmem>>, %arg8: memref<128x128xbf16, #tpu.memory_space<vmem>>, %arg9: memref<1x128xf32, #tpu.memory_space<vmem>>, %arg10: memref<8x128xf32, #tpu.memory_space<vmem>>) attributes {dimension_semantics = [#tpu.dimension_semantics<parallel>], iteration_bounds = array<i64: 1>, scalar_prefetch = 0 : i64, scratch_operands = 0 : i64, tpu.core_type = #tpu.core_type<tc>, window_params = [{transform_indices = @transform_0, window_bounds = array<i64: 8, 384>}, {pipeline_mode = #tpu.pipeline_mode<synchronous>, transform_indices = @transform_1, window_bounds = array<i64: 384, 256>}, {pipeline_mode = #tpu.pipeline_mode<synchronous>, transform_indices = @transform_2, window_bounds = array<i64: 1, 256>}, {pipeline_mode = #tpu.pipeline_mode<synchronous>, transform_indices = @transform_3, window_bounds = array<i64: 256, 256>}, {pipeline_mode = #tpu.pipeline_mode<synchronous>, transform_indices = @transform_4, window_bounds = array<i64: 1, 256>}, {pipeline_mode = #tpu.pipeline_mode<synchronous>, transform_indices = @transform_5, window_bounds = array<i64: 256, 128>}, {pipeline_mode = #tpu.pipeline_mode<synchronous>, transform_indices = @transform_6, window_bounds = array<i64: 1, 128>}, {pipeline_mode = #tpu.pipeline_mode<synchronous>, transform_indices = @transform_7, window_bounds = array<i64: 128, 128>}, {pipeline_mode = #tpu.pipeline_mode<synchronous>, transform_indices = @transform_8, window_bounds = array<i64: 1, 128>}, {transform_indices = @transform_9, window_bounds = array<i64: 8, 128>}]} {
    %c0 = arith.constant 0 : index
    %c0_0 = arith.constant 0 : index
    %0 = vector.load %arg1[%c0, %c0_0] : memref<8x384xbf16, #tpu.memory_space<vmem>>, vector<8x384xbf16>
    %c0_1 = arith.constant 0 : index
    %c0_2 = arith.constant 0 : index
    %1 = vector.load %arg2[%c0_1, %c0_2] : memref<384x256xbf16, #tpu.memory_space<vmem>>, vector<384x256xbf16>
    %cst = arith.constant dense<0.000000e+00> : vector<8x256xf32>
    %2 = tpu.matmul %0, %1, %cst {dimension_numbers = #tpu.dot_dimension_numbers<[1], [0], [0], [1], [0, 0, 1, 1], [], []>} : vector<8x384xbf16>, vector<384x256xbf16>, vector<8x256xf32> -> vector<8x256xf32>
    %c0_3 = arith.constant 0 : index
    %c0_4 = arith.constant 0 : index
    %3 = vector.load %arg3[%c0_3, %c0_4] : memref<1x256xf32, #tpu.memory_space<vmem>>, vector<1x256xf32>
    %4 = vector.broadcast %3 : vector<1x256xf32> to vector<8x256xf32>
    %5 = arith.addf %2, %4 : vector<8x256xf32>
    %cst_5 = arith.constant 3.000000e+00 : f32
    %6 = vector.broadcast %cst_5 : f32 to vector<8x256xf32>
    %7 = arith.mulf %6, %5 : vector<8x256xf32>
    %cst_6 = arith.constant 0.000000e+00 : f32
    %8 = vector.broadcast %cst_6 : f32 to vector<8x256xf32>
    %9 = arith.maximumf %7, %8 : vector<8x256xf32>
    %10 = math.absf %7 : vector<8x256xf32>
    %cst_7 = arith.constant 0.000000e+00 : f32
    %11 = vector.broadcast %cst_7 : f32 to vector<8x256xf32>
    %12 = arith.subf %11, %10 : vector<8x256xf32>
    %13 = math.exp %12 : vector<8x256xf32>
    %14 = math.log1p %13 : vector<8x256xf32>
    %15 = arith.addf %9, %14 : vector<8x256xf32>
    %cst_8 = arith.constant 3.000000e+00 : f32
    %16 = vector.broadcast %cst_8 : f32 to vector<8x256xf32>
    %17 = arith.divf %15, %16 : vector<8x256xf32>
    %cst_9 = arith.constant 2.000000e+01 : f32
    %18 = vector.broadcast %cst_9 : f32 to vector<8x256xf32>
    %19 = arith.cmpf ogt, %7, %18 : vector<8x256xf32>
    %20 = arith.select %19, %5, %17 : vector<8x256xi1>, vector<8x256xf32>
    %21 = arith.truncf %20 : vector<8x256xf32> to vector<8x256xbf16>
    %c0_10 = arith.constant 0 : index
    %c0_11 = arith.constant 0 : index
    %22 = vector.load %arg4[%c0_10, %c0_11] : memref<256x256xbf16, #tpu.memory_space<vmem>>, vector<256x256xbf16>
    %cst_12 = arith.constant dense<0.000000e+00> : vector<8x256xf32>
    %23 = tpu.matmul %21, %22, %cst_12 {dimension_numbers = #tpu.dot_dimension_numbers<[1], [0], [0], [1], [0, 0, 1, 1], [], []>} : vector<8x256xbf16>, vector<256x256xbf16>, vector<8x256xf32> -> vector<8x256xf32>
    %c0_13 = arith.constant 0 : index
    %c0_14 = arith.constant 0 : index
    %24 = vector.load %arg5[%c0_13, %c0_14] : memref<1x256xf32, #tpu.memory_space<vmem>>, vector<1x256xf32>
    %25 = vector.broadcast %24 : vector<1x256xf32> to vector<8x256xf32>
    %26 = arith.addf %23, %25 : vector<8x256xf32>
    %27 = math.tanh %26 : vector<8x256xf32>
    %28 = arith.truncf %27 : vector<8x256xf32> to vector<8x256xbf16>
    %c0_15 = arith.constant 0 : index
    %c0_16 = arith.constant 0 : index
    %29 = vector.load %arg6[%c0_15, %c0_16] : memref<256x128xbf16, #tpu.memory_space<vmem>>, vector<256x128xbf16>
    %cst_17 = arith.constant dense<0.000000e+00> : vector<8x128xf32>
    %30 = tpu.matmul %28, %29, %cst_17 {dimension_numbers = #tpu.dot_dimension_numbers<[1], [0], [0], [1], [0, 0, 1, 1], [], []>} : vector<8x256xbf16>, vector<256x128xbf16>, vector<8x128xf32> -> vector<8x128xf32>
    %c0_18 = arith.constant 0 : index
    %c0_19 = arith.constant 0 : index
    %31 = vector.load %arg7[%c0_18, %c0_19] : memref<1x128xf32, #tpu.memory_space<vmem>>, vector<1x128xf32>
    %32 = vector.broadcast %31 : vector<1x128xf32> to vector<8x128xf32>
    %33 = arith.addf %30, %32 : vector<8x128xf32>
    %34 = math.tanh %33 : vector<8x128xf32>
    %35 = arith.truncf %34 : vector<8x128xf32> to vector<8x128xbf16>
    %c0_20 = arith.constant 0 : index
    %c0_21 = arith.constant 0 : index
    %36 = vector.load %arg8[%c0_20, %c0_21] : memref<128x128xbf16, #tpu.memory_space<vmem>>, vector<128x128xbf16>
    %cst_22 = arith.constant dense<0.000000e+00> : vector<8x128xf32>
    %37 = tpu.matmul %35, %36, %cst_22 {dimension_numbers = #tpu.dot_dimension_numbers<[1], [0], [0], [1], [0, 0, 1, 1], [], []>} : vector<8x128xbf16>, vector<128x128xbf16>, vector<8x128xf32> -> vector<8x128xf32>
    %c0_23 = arith.constant 0 : index
    %c0_24 = arith.constant 0 : index
    %38 = vector.load %arg9[%c0_23, %c0_24] : memref<1x128xf32, #tpu.memory_space<vmem>>, vector<1x128xf32>
    %39 = vector.broadcast %38 : vector<1x128xf32> to vector<8x128xf32>
    %40 = arith.addf %37, %39 : vector<8x128xf32>
    %c0_25 = arith.constant 0 : index
    %c0_26 = arith.constant 0 : index
    %41 = vector.load %arg10[%c0_25, %c0_26] : memref<8x128xf32, #tpu.memory_space<vmem>>, vector<8x128xf32>
    tpu.vector_store %arg10[%c0_25, %c0_26], %40 {strides = array<i32>} : memref<8x128xf32, #tpu.memory_space<vmem>>, vector<8x128xf32>,
    return
  }
  func.func @transform_0(%arg0: i32) -> (i32, i32) {
    %c0_i32 = arith.constant 0 : i32
    %c0_i32_0 = arith.constant 0 : i32
    return %arg0, %c0_i32 : i32, i32
  }
  func.func @transform_1(%arg0: i32) -> (i32, i32) {
    %c0_i32 = arith.constant 0 : i32
    %c0_i32_0 = arith.constant 0 : i32
    %c0_i32_1 = arith.constant 0 : i32
    return %c0_i32, %c0_i32_0 : i32, i32
  }
  func.func @transform_2(%arg0: i32) -> (i32, i32) {
    %c0_i32 = arith.constant 0 : i32
    %c0_i32_0 = arith.constant 0 : i32
    %c0_i32_1 = arith.constant 0 : i32
    return %c0_i32, %c0_i32_0 : i32, i32
  }
  func.func @transform_3(%arg0: i32) -> (i32, i32) {
    %c0_i32 = arith.constant 0 : i32
    %c0_i32_0 = arith.constant 0 : i32
    %c0_i32_1 = arith.constant 0 : i32
    return %c0_i32, %c0_i32_0 : i32, i32
  }
  func.func @transform_4(%arg0: i32) -> (i32, i32) {
    %c0_i32 = arith.constant 0 : i32
    %c0_i32_0 = arith.constant 0 : i32
    %c0_i32_1 = arith.constant 0 : i32
    return %c0_i32, %c0_i32_0 : i32, i32
  }
  func.func @transform_5(%arg0: i32) -> (i32, i32) {
    %c0_i32 = arith.constant 0 : i32
    %c0_i32_0 = arith.constant 0 : i32
    %c0_i32_1 = arith.constant 0 : i32
    return %c0_i32, %c0_i32_0 : i32, i32
  }
  func.func @transform_6(%arg0: i32) -> (i32, i32) {
    %c0_i32 = arith.constant 0 : i32
    %c0_i32_0 = arith.constant 0 : i32
    %c0_i32_1 = arith.constant 0 : i32
    return %c0_i32, %c0_i32_0 : i32, i32
  }
  func.func @transform_7(%arg0: i32) -> (i32, i32) {
    %c0_i32 = arith.constant 0 : i32
    %c0_i32_0 = arith.constant 0 : i32
    %c0_i32_1 = arith.constant 0 : i32
    return %c0_i32, %c0_i32_0 : i32, i32
  }
  func.func @transform_8(%arg0: i32) -> (i32, i32) {
    %c0_i32 = arith.constant 0 : i32
    %c0_i32_0 = arith.constant 0 : i32
    %c0_i32_1 = arith.constant 0 : i32
    return %c0_i32, %c0_i32_0 : i32, i32
  }
  func.func @transform_9(%arg0: i32) -> (i32, i32) {
    %c0_i32 = arith.constant 0 : i32
    %c0_i32_0 = arith.constant 0 : i32
    return %arg0, %c0_i32 : i32, i32
  }
}

</mosaic_0001>

<bundles_post_ra>
// kernel: deconstructor_forward.1
= control target key start
LH: loop header
LB: loop body
LE: loop exit
PB: predicated region body
PF: predicated region fallthrough
CT: control target
= control target key end

     0   :  { %14 = vsyncpa [#allocation3], 0  ;;  %s1673_s0 = inlined_call_operand.vmem [shape: bf16[8,384], index: 0, kind: input, shape index: {}]   ;;  %s1674_s1 = inlined_call_operand.hbm [shape: bf16[384,256], index: 1, kind: input, shape index: {}]   ;;  %s1675_s2 = inlined_call_operand.vmem [shape: f32[1,256], index: 2, kind: input, shape index: {}]   ;;  %s1676_s3 = inlined_call_operand.hbm [shape: bf16[256,256], index: 3, kind: input, shape index: {}]   ;;  %s1677_s4 = inlined_call_operand.vmem [shape: f32[1,256], index: 4, kind: input, shape index: {}]   ;;  %s1678_s5 = inlined_call_operand.hbm [shape: bf16[256,128], index: 5, kind: input, shape index: {}]   ;;  %s1679_s6 = inlined_call_operand.vmem [shape: f32[1,128], index: 6, kind: input, shape index: {}]   ;;  %s1680_s7 = inlined_call_operand.vmem [shape: bf16[128,128], index: 7, kind: input, shape index: {}]   ;;  %s1681_s8 = inlined_call_operand.vmem [shape: f32[1,128], index: 8, kind: input, shape index: {}]   ;;  %s1682_s9 = inlined_call_operand.hbm [shape: f32[8,128], index: 9, kind: output, shape index: {}]  }
   0x1   :  { %15 = vsyncpa [#allocation6], 0 }
   0x2   :  { %16 = vsyncpa [#allocation4], 0  ;;  %s1497_s30 = smov [#allocation5]   ;;  %s1498_s11 = smov [#allocation2]  }
   0x3   :  { %s38_s10 = sshll.u32 %s1497_s30, 4  ;;  %s24_s12 = sshll.u32 %s1498_s11, 4  ;;  %s39_s10 = int_to_ptr.vmem [resolvable:$true] %s38_s10  ;;  %s1558_s12 = int_to_ptr.vmem [resolvable:$true] %s24_s12 }
   0x4   :  { %s1403_s15 = scalar_lea.hbm %s1676_s3, 4096 }
   0x5   :  { %p1404_p0 = scmp.ne.s32.totalorder %s1676_s3, %s1403_s15  ;;  %p1407_p1 = scmp.lt.u32.totalorder %s1403_s15, %s1676_s3 }
   0x7   :  { %p1409_p2 = pnand %p1407_p1, %p1404_p0 }
   0x9   :  { %1412 = shalt.err (!%p1409_p2)
}
   0xa   :  { %s1413_s20 = scalar_lea.vmem %s39_s10, 4096  ;;  %p1418_p4 = scmp.lt.s32.totalorder %s39_s10, %s39_s10 }
   0xb   :  { %p1414_p3 = scmp.ne.s32.totalorder %s39_s10, %s1413_s20  ;;  %p1419_p5 = scmp.lt.s32.totalorder %s1413_s20, %s1413_s20 }
   0xd   :  { %p1420_p6 = por %p1419_p5, %p1418_p4 }
   0xf   :  { %p1421_p7 = pnand %p1420_p6, %p1414_p3 }
  0x11   :  { %1424 = shalt.err (!%p1421_p7)
}
  0x12   :  { %s1499_s21 = smov 128   ;;  %s1500_s22 = smov 8  }
  0x13   :  { %44 = dma.hbm_to_vmem [thread:$0]  %s1676_s3, 4096, %s39_s10, [#allocation6], %s1499_s21, %s1499_s21, %s1500_s22  }
  0x14   :  { %s1425_s27 = scalar_lea.hbm %s1674_s1, 6144 }
  0x15   :  { %p1426_p8 = scmp.ne.s32.totalorder %s1674_s1, %s1425_s27  ;;  %p1429_p9 = scmp.lt.u32.totalorder %s1425_s27, %s1674_s1 }
  0x17   :  { %p1431_p10 = pnand %p1429_p9, %p1426_p8 }
  0x19   :  { %1434 = shalt.err (!%p1431_p10)
}
  0x1a   :  { %s1435_s13 = scalar_lea.vmem %s1558_s12, 6144  ;;  %p1440_p12 = scmp.lt.s32.totalorder %s1558_s12, %s1558_s12 }
  0x1b   :  { %p1436_p11 = scmp.ne.s32.totalorder %s1558_s12, %s1435_s13  ;;  %p1441_p13 = scmp.lt.s32.totalorder %s1435_s13, %s1435_s13 }
  0x1d   :  { %p1442_p0 = por %p1441_p13, %p1440_p12 }
  0x1f   :  { %p1443_p1 = pnand %p1442_p0, %p1436_p11 }
  0x21   :  { %1446 = shalt.err (!%p1443_p1)
}
  0x22   :  { %30 = dma.hbm_to_vmem [thread:$0]  %s1674_s1, 6144, %s1558_s12, [#allocation3], %s1499_s21, %s1499_s21, %s1500_s22  }
  0x23   :  { %s1501_s14 = smov [#allocation7]   ;;  %s1447_s18 = scalar_lea.hbm %s1678_s5, 2048 }
  0x24   :  { %s52_s15 = sshll.u32 %s1501_s14, 4  ;;  %p1448_p2 = scmp.ne.s32.totalorder %s1678_s5, %s1447_s18  ;;  %s53_s15 = int_to_ptr.vmem [resolvable:$true] %s52_s15 }
  0x25   :  { %p1451_p3 = scmp.lt.u32.totalorder %s1447_s18, %s1678_s5 }
  0x27   :  { %p1453_p4 = pnand %p1451_p3, %p1448_p2 }
  0x29   :  { %1456 = shalt.err (!%p1453_p4)
}
  0x2a   :  { %s1457_s25 = scalar_lea.vmem %s53_s15, 2048  ;;  %p1462_p6 = scmp.lt.s32.totalorder %s53_s15, %s53_s15 }
  0x2b   :  { %p1458_p5 = scmp.ne.s32.totalorder %s53_s15, %s1457_s25  ;;  %p1463_p7 = scmp.lt.s32.totalorder %s1457_s25, %s1457_s25 }
  0x2d   :  { %p1464_p8 = por %p1463_p7, %p1462_p6 }
  0x2f   :  { %p1465_p9 = pnand %p1464_p8, %p1458_p5 }
  0x31   :  { %1468 = shalt.err (!%p1465_p9)
}
  0x32   :  { %s1502_s1 = smov 64   ;;  %s1503_s12 = smov 4  }
  0x33   :  { %58 = dma.hbm_to_vmem [thread:$0]  %s1678_s5, 2048, %s53_s15, [#allocation6], %s1502_s1, %s1502_s1, %s1503_s12  }
  0x34   :  { %1491 = dma.done.wait [#allocation3], 6144  }
  0x35   :  { %1492 = vsyncadd [#allocation3], 4294961152 }
  0x36   :  { %1493 = dma.done.wait [#allocation6], 6144  }
  0x37   :  { %1494 = vsyncadd [#allocation6], 4294961152  ;;  %v1242_v0 = vld [vmem:[#allocation2 + $0x4] ss:$8 sps:$4 sm:$0xff]   ;;  %v1244_v1 = vld [vmem:[#allocation2] ss:$8 sps:$4 sm:$0xff]  }
  0x38   :  { %388 = vmatprep.subr.bf16.mxu0 %v1242_v0  ;;  %v1245_v2 = vld [vmem:[#allocation2 + $0x14] ss:$8 sps:$4 sm:$0xff]   ;;  %v1247_v3 = vld [vmem:[#allocation2 + $0x10] ss:$8 sps:$4 sm:$0xff]   ;;  %v1248_v4 = vld [vmem:[#allocation2 + $0x24] ss:$8 sps:$4 sm:$0xff]  }
  0x39   :  { %389 = vmatpush1.bf16.msra.mxu0 %v1244_v1  ;;  %v1250_v5 = vld [vmem:[#allocation2 + $0x20] ss:$8 sps:$4 sm:$0xff]   ;;  %v1251_v6 = vld [vmem:[#allocation2 + $0x34] ss:$8 sps:$4 sm:$0xff]   ;;  %v1253_v7 = vld [vmem:[#allocation2 + $0x30] ss:$8 sps:$4 sm:$0xff]  }
  0x3a   :  { %390 = vmatprep.subr.bf16.mxu0 %v1245_v2  ;;  %v1254_v8 = vld [vmem:[#allocation2 + $0x44] ss:$8 sps:$4 sm:$0xff]   ;;  %v1256_v9 = vld [vmem:[#allocation2 + $0x40] ss:$8 sps:$4 sm:$0xff]   ;;  %v1257_v10 = vld [vmem:[#allocation2 + $0x54] ss:$8 sps:$4 sm:$0xff]  }
  0x3b   :  { %v1259_v11 = vld [vmem:[#allocation2 + $0x50] ss:$8 sps:$4 sm:$0xff]   ;;  %v1260_v12 = vld [vmem:[#allocation2 + $0x64] ss:$8 sps:$4 sm:$0xff]   ;;  %v1262_v15 = vld [vmem:[#allocation2 + $0x60] ss:$8 sps:$4 sm:$0xff]  }
  0x3c   :  { %v1604_v13 = vld [vmem:[%s1673_s0] sm:$0xff]  ;;  %v1263_v16 = vld [vmem:[#allocation2 + $0x74] ss:$8 sps:$4 sm:$0xff]   ;;  %v1265_v17 = vld [vmem:[#allocation2 + $0x70] ss:$8 sps:$4 sm:$0xff]   ;;  %v1504_v48 = vmov 0  }
  0x3d   :  { %391 = vmatpush1.bf16.msra.mxu0 %v1247_v3  ;;  %v1066_v14 = vcombine.high %v1604_v13, %v1604_v13  ;;  %v1266_v18 = vld [vmem:[#allocation2 + $0x84] ss:$8 sps:$4 sm:$0xff]   ;;  %v1268_v19 = vld [vmem:[#allocation2 + $0x80] ss:$8 sps:$4 sm:$0xff]   ;;  %v1269_v20 = vld [vmem:[#allocation2 + $0x94] ss:$8 sps:$4 sm:$0xff]   ;;  %v1065_v44 = vcombine.low %v1604_v13, %v1604_v13 }
  0x3e   :  { %392 = vmatprep.subr.bf16.mxu0 %v1248_v4  ;;  %v1317_v21 = vld [vmem:[#allocation5 + $0x4] ss:$8 sps:$4 sm:$0xff]   ;;  %v1319_v22 = vld [vmem:[#allocation5] ss:$8 sps:$4 sm:$0xff]   ;;  %v1271_v23 = vld [vmem:[#allocation2 + $0x90] ss:$8 sps:$4 sm:$0xff]  }
  0x3f   :  { %420 = vmatprep.mubr.bf16.mxu0 %v1066_v14  ;;  %715 = vmatprep.subr.bf16.mxu1 %v1317_v21  ;;  %v1320_v24 = vld [vmem:[#allocation5 + $0x14] ss:$8 sps:$4 sm:$0xff]   ;;  %v1272_v25 = vld [vmem:[#allocation2 + $0xa4] ss:$8 sps:$4 sm:$0xff]   ;;  %v1322_v26 = vld [vmem:[#allocation5 + $0x10] ss:$8 sps:$4 sm:$0xff]  }
  0x40   :  { %716 = vmatpush1.bf16.msra.mxu1 %v1319_v22  ;;  %v1274_v27 = vld [vmem:[#allocation2 + $0xa0] ss:$8 sps:$4 sm:$0xff]   ;;  %v1323_v28 = vld [vmem:[#allocation5 + $0x24] ss:$8 sps:$4 sm:$0xff]   ;;  %v1275_v29 = vld [vmem:[#allocation2 + $0xb4] ss:$8 sps:$4 sm:$0xff]   ;;  %v127_v22 = vlaneseq }
  0x41   :  { %393 = vmatpush1.bf16.msra.mxu0 %v1250_v5  ;;  %717 = vmatprep.subr.bf16.mxu1 %v1320_v24  ;;  %v1325_v30 = vld [vmem:[#allocation5 + $0x20] ss:$8 sps:$4 sm:$0xff]   ;;  %v1326_v31 = vld [vmem:[#allocation5 + $0x34] ss:$8 sps:$4 sm:$0xff]   ;;  %v1277_v32 = vld [vmem:[#allocation2 + $0xb0] ss:$8 sps:$4 sm:$0xff]  }
  0x42   :  { %394 = vmatprep.subr.bf16.mxu0 %v1251_v6  ;;  %v1278_v33 = vld [vmem:[#allocation2 + $0xc4] ss:$8 sps:$4 sm:$0xff]   ;;  %v1328_v34 = vld [vmem:[#allocation5 + $0x30] ss:$8 sps:$4 sm:$0xff]   ;;  %v1280_v36 = vld [vmem:[#allocation2 + $0xc0] ss:$8 sps:$4 sm:$0xff]  }
  0x43   :  { %v1329_v35 = vld [vmem:[#allocation5 + $0x44] ss:$8 sps:$4 sm:$0xff]   ;;  %v1281_v37 = vld [vmem:[#allocation2 + $0xd4] ss:$8 sps:$4 sm:$0xff]   ;;  %v1283_v38 = vld [vmem:[#allocation2 + $0xd0] ss:$8 sps:$4 sm:$0xff]  }
  0x44   :  { %718 = vmatpush1.bf16.msra.mxu1 %v1322_v26  ;;  %v1284_v39 = vld [vmem:[#allocation2 + $0xe4] ss:$8 sps:$4 sm:$0xff]   ;;  %v1286_v40 = vld [vmem:[#allocation2 + $0xe0] ss:$8 sps:$4 sm:$0xff]   ;;  %v1287_v41 = vld [vmem:[#allocation2 + $0xf4] ss:$8 sps:$4 sm:$0xff]  }
  0x45   :  { %395 = vmatpush1.bf16.msra.mxu0 %v1253_v7  ;;  %719 = vmatprep.subr.bf16.mxu1 %v1323_v28  ;;  %v1289_v42 = vld [vmem:[#allocation2 + $0xf0] ss:$8 sps:$4 sm:$0xff]   ;;  %v1294_v43 = vld [vmem:[#allocation2 + $0x104] ss:$8 sps:$4 sm:$0xff]   ;;  %v1292_v45 = vld [vmem:[#allocation2 + $0x100] ss:$8 sps:$4 sm:$0xff]  }
  0x46   :  { %396 = vmatprep.subr.bf16.mxu0 %v1254_v8  ;;  %v1297_v46 = vld [vmem:[#allocation2 + $0x114] ss:$8 sps:$4 sm:$0xff]   ;;  %v1295_v47 = vld [vmem:[#allocation2 + $0x110] ss:$8 sps:$4 sm:$0xff]   ;;  %v1300_v49 = vld [vmem:[#allocation2 + $0x124] ss:$8 sps:$4 sm:$0xff]  }
  0x47   :  { %v1298_v50 = vld [vmem:[#allocation2 + $0x120] ss:$8 sps:$4 sm:$0xff]   ;;  %v1303_v51 = vld [vmem:[#allocation2 + $0x134] ss:$8 sps:$4 sm:$0xff]   ;;  %v1301_v52 = vld [vmem:[#allocation2 + $0x130] ss:$8 sps:$4 sm:$0xff]  }
  0x48   :  { %720 = vmatpush1.bf16.msra.mxu1 %v1325_v30  ;;  %v1306_v53 = vld [vmem:[#allocation2 + $0x144] ss:$8 sps:$4 sm:$0xff]   ;;  %v1304_v54 = vld [vmem:[#allocation2 + $0x140] ss:$8 sps:$4 sm:$0xff]   ;;  %v1309_v55 = vld [vmem:[#allocation2 + $0x154] ss:$8 sps:$4 sm:$0xff]  }
  0x49   :  { %397 = vmatpush1.bf16.msra.mxu0 %v1256_v9  ;;  %721 = vmatprep.subr.bf16.mxu1 %v1326_v31  ;;  %v1307_v56 = vld [vmem:[#allocation2 + $0x150] ss:$8 sps:$4 sm:$0xff]   ;;  %v1312_v57 = vld [vmem:[#allocation2 + $0x164] ss:$8 sps:$4 sm:$0xff]   ;;  %v1310_v58 = vld [vmem:[#allocation2 + $0x160] ss:$8 sps:$4 sm:$0xff]  }
  0x4a   :  { %398 = vmatprep.subr.bf16.mxu0 %v1257_v10  ;;  %v1315_v59 = vld [vmem:[#allocation2 + $0x174] ss:$8 sps:$4 sm:$0xff]   ;;  %v1313_v60 = vld [vmem:[#allocation2 + $0x170] ss:$8 sps:$4 sm:$0xff]   ;;  %v1316_v61 = vld [vmem:[%s1673_s0 + $0x8] ss:$0 sps:$4 sm:$0xff]  }
  0x4b   :  { %v1331_v62 = vld [vmem:[#allocation5 + $0x40] ss:$8 sps:$4 sm:$0xff]   ;;  %v1332_v63 = vld [vmem:[#allocation5 + $0x54] ss:$8 sps:$4 sm:$0xff]   ;;  %v1334_v0 = vld [vmem:[#allocation5 + $0x50] ss:$8 sps:$4 sm:$0xff]  }
  0x4c   :  { %722 = vmatpush1.bf16.msra.mxu1 %v1328_v34  ;;  %v1335_v1 = vld [vmem:[#allocation5 + $0x64] ss:$8 sps:$4 sm:$0xff]   ;;  %v1337_v2 = vld [vmem:[#allocation5 + $0x60] ss:$8 sps:$4 sm:$0xff]   ;;  %v1338_v3 = vld [vmem:[#allocation5 + $0x74] ss:$8 sps:$4 sm:$0xff]  }
  0x4d   :  { %399 = vmatpush1.bf16.msra.mxu0 %v1259_v11  ;;  %723 = vmatprep.subr.bf16.mxu1 %v1329_v35  ;;  %v1340_v4 = vld [vmem:[#allocation5 + $0x70] ss:$8 sps:$4 sm:$0xff]   ;;  %v1341_v5 = vld [vmem:[#allocation5 + $0x84] ss:$8 sps:$4 sm:$0xff]   ;;  %v1343_v6 = vld [vmem:[#allocation5 + $0x80] ss:$8 sps:$4 sm:$0xff]  }
  0x4e   :  { %400 = vmatprep.subr.bf16.mxu0 %v1260_v12  ;;  %v1344_v7 = vld [vmem:[#allocation5 + $0x94] ss:$8 sps:$4 sm:$0xff]   ;;  %v1346_v8 = vld [vmem:[#allocation5 + $0x90] ss:$8 sps:$4 sm:$0xff]   ;;  %v1347_v9 = vld [vmem:[#allocation5 + $0xa4] ss:$8 sps:$4 sm:$0xff]  }
  0x4f   :  { %v1349_v10 = vld [vmem:[#allocation5 + $0xa0] ss:$8 sps:$4 sm:$0xff]   ;;  %v1350_v11 = vld [vmem:[#allocation5 + $0xb4] ss:$8 sps:$4 sm:$0xff]   ;;  %v1352_v12 = vld [vmem:[#allocation5 + $0xb0] ss:$8 sps:$4 sm:$0xff]  }
  0x50   :  { %724 = vmatpush1.bf16.msra.mxu1 %v1331_v62  ;;  %v1353_v13 = vld [vmem:[#allocation5 + $0xc4] ss:$8 sps:$4 sm:$0xff]   ;;  %v1355_v14 = vld [vmem:[#allocation5 + $0xc0] ss:$8 sps:$4 sm:$0xff]   ;;  %vm1506_vm4 = vmmov 0  }
  0x51   :  { %401 = vmatpush1.bf16.msra.mxu0 %v1262_v15  ;;  %725 = vmatprep.subr.bf16.mxu1 %v1332_v63  ;;  %v1356_v15 = vld [vmem:[#allocation5 + $0xd4] ss:$8 sps:$4 sm:$0xff]   ;;  %v1365_v21 = vld [vmem:[#allocation7 + $0x40] sm:$0xff]  }
  0x52   :  { %402 = vmatprep.subr.bf16.mxu0 %v1263_v16  ;;  %v1358_v16 = vld [vmem:[#allocation5 + $0xd0] ss:$8 sps:$4 sm:$0xff]  }
  0x54   :  { %726 = vmatpush1.bf16.msra.mxu1 %v1334_v0 }
  0x55   :  { %403 = vmatpush1.bf16.msra.mxu0 %v1265_v17  ;;  %727 = vmatprep.subr.bf16.mxu1 %v1335_v1  ;;  %v1359_v17 = vld [vmem:[#allocation5 + $0xe4] ss:$8 sps:$4 sm:$0xff]  }
  0x56   :  { %404 = vmatprep.subr.bf16.mxu0 %v1266_v18  ;;  %v1361_v18 = vld [vmem:[#allocation5 + $0xe0] ss:$8 sps:$4 sm:$0xff]  }
  0x58   :  { %728 = vmatpush1.bf16.msra.mxu1 %v1337_v2 }
  0x59   :  { %405 = vmatpush1.bf16.msra.mxu0 %v1268_v19  ;;  %729 = vmatprep.subr.bf16.mxu1 %v1338_v3  ;;  %v1362_v19 = vld [vmem:[#allocation5 + $0xf4] ss:$8 sps:$4 sm:$0xff]  }
  0x5a   :  { %406 = vmatprep.subr.bf16.mxu0 %v1269_v20  ;;  %v1364_v20 = vld [vmem:[#allocation5 + $0xf0] ss:$8 sps:$4 sm:$0xff]  }
  0x5c   :  { %730 = vmatpush1.bf16.msra.mxu1 %v1340_v4 }
  0x5d   :  { %407 = vmatpush1.bf16.msra.mxu0 %v1271_v23  ;;  %731 = vmatprep.subr.bf16.mxu1 %v1341_v5  ;;  %v1613_v23 = vshrl.u32 %v127_v22, 7  ;;  %v1381_v22 = vld [vmem:[%s1680_s7] sm:$0xff]  }
  0x5e   :  { %408 = vmatprep.subr.bf16.mxu0 %v1272_v25  ;;  %v125_v25 = vld [vmem:[%s1675_s2] sm:$0x3] }
  0x5f   :  { %v129_v24 = vsub.s32 0, %v1613_v23  ;;  %v133_v26 = vsub.s32 1, %v1613_v23  ;;  %v1385_v23 = vld [vmem:[%s1680_s7 + $0x20] sm:$0xff]  }
  0x60   :  { %732 = vmatpush1.bf16.msra.mxu1 %v1343_v6  ;;  %v1366_v6 = vld [vmem:[#allocation7] sm:$0xff]  }
  0x61   :  { %409 = vmatpush1.bf16.msra.mxu0 %v1274_v27  ;;  %733 = vmatprep.subr.bf16.mxu1 %v1344_v7  ;;  %v130_v27 = vrot.slane %v125_v25, %v129_v24  ;;  %v134_v28 = vrot.slane %v125_v25, %v133_v26  ;;  %v1505_v25 = vmov 0.0  }
  0x62   :  { %410 = vmatprep.subr.bf16.mxu0 %v1275_v29 }
  0x64   :  { %734 = vmatpush1.bf16.msra.mxu1 %v1346_v8  ;;  %v1367_v8 = vld [vmem:[#allocation7 + $0x48] sm:$0xff]  }
  0x65   :  { %411 = vmatpush1.bf16.msra.mxu0 %v1277_v32  ;;  %735 = vmatprep.subr.bf16.mxu1 %v1347_v9  ;;  %v1368_v9 = vld [vmem:[#allocation7 + $0x8] sm:$0xff]  }
  0x66   :  { %412 = vmatprep.subr.bf16.mxu0 %v1278_v33 }
  0x68   :  { %736 = vmatpush1.bf16.msra.mxu1 %v1349_v10  ;;  %v1369_v10 = vld [vmem:[#allocation7 + $0x50] sm:$0xff]  }
  0x69   :  { %413 = vmatpush1.bf16.msra.mxu0 %v1280_v36  ;;  %737 = vmatprep.subr.bf16.mxu1 %v1350_v11  ;;  %v1370_v11 = vld [vmem:[#allocation7 + $0x10] sm:$0xff]  }
  0x6a   :  { %414 = vmatprep.subr.bf16.mxu0 %v1281_v37 }
  0x6c   :  { %738 = vmatpush1.bf16.msra.mxu1 %v1352_v12  ;;  %v1371_v12 = vld [vmem:[#allocation7 + $0x58] sm:$0xff]  }
  0x6d   :  { %415 = vmatpush1.bf16.msra.mxu0 %v1283_v38  ;;  %739 = vmatprep.subr.bf16.mxu1 %v1353_v13  ;;  %v1372_v13 = vld [vmem:[#allocation7 + $0x18] sm:$0xff]  }
  0x6e   :  { %416 = vmatprep.subr.bf16.mxu0 %v1284_v39 }
  0x70   :  { %740 = vmatpush1.bf16.msra.mxu1 %v1355_v14  ;;  %v1373_v14 = vld [vmem:[#allocation7 + $0x60] sm:$0xff]  }
  0x71   :  { %417 = vmatpush1.bf16.msra.mxu0 %v1286_v40  ;;  %741 = vmatprep.subr.bf16.mxu1 %v1356_v15  ;;  %v1374_v15 = vld [vmem:[#allocation7 + $0x20] sm:$0xff]  }
  0x72   :  { %418 = vmatprep.subr.bf16.mxu0 %v1287_v41 }
  0x74   :  { %742 = vmatpush1.bf16.msra.mxu1 %v1358_v16  ;;  %v1375_v16 = vld [vmem:[#allocation7 + $0x68] sm:$0xff]  }
  0x75   :  { %419 = vmatpush1.bf16.msra.mxu0 %v1289_v42  ;;  %743 = vmatprep.subr.bf16.mxu1 %v1359_v17  ;;  %v1376_v17 = vld [vmem:[#allocation7 + $0x28] sm:$0xff]  }
  0x76   :  { %429 = vmatprep.subr.bf16.mxu0 %v1294_v43 }
  0x78   :  { %421 = vmatmul.mubr.bf16.vlgmr.msra.gmra.mrb[0].mxu0 %v1065_v44  ;;  %744 = vmatpush1.bf16.msra.mxu1 %v1361_v18  ;;  %v1377_v18 = vld [vmem:[#allocation7 + $0x70] sm:$0xff]  }
  0x79   :  { %430 = vmatpush1.bf16.msra.mxu0 %v1292_v45  ;;  %461 = vmatprep.mubr.bf16.mxu0 %v1504_v48 }
  0x7a   :  { %431 = vmatprep.subr.bf16.mxu0 %v1297_v46  ;;  %745 = vmatprep.subr.bf16.mxu1 %v1362_v19  ;;  %v1378_v19 = vld [vmem:[#allocation7 + $0x30] sm:$0xff]  }
  0x7c   :  { %746 = vmatpush1.bf16.msra.mxu1 %v1364_v20  ;;  %v1379_v20 = vld [vmem:[#allocation7 + $0x78] sm:$0xff]  }
  0x7d   :  { %432 = vmatpush1.bf16.msra.mxu0 %v1295_v47  ;;  %1174 = vmatprep.subr.bf16.mxu1 %v1365_v21  ;;  %v1380_v21 = vld [vmem:[#allocation7 + $0x38] sm:$0xff]  }
  0x7e   :  { %433 = vmatprep.subr.bf16.mxu0 %v1300_v49 }
  0x81   :  { %434 = vmatpush1.bf16.msra.mxu0 %v1298_v50 }
  0x82   :  { %435 = vmatprep.subr.bf16.mxu0 %v1303_v51 }
  0x85   :  { %436 = vmatpush1.bf16.msra.mxu0 %v1301_v52 }
  0x86   :  { %437 = vmatprep.subr.bf16.mxu0 %v1306_v53 }
  0x89   :  { %438 = vmatpush1.bf16.msra.mxu0 %v1304_v54 }
  0x8a   :  { %439 = vmatprep.subr.bf16.mxu0 %v1309_v55 }
  0x8d   :  { %440 = vmatpush1.bf16.msra.mxu0 %v1307_v56 }
  0x8e   :  { %441 = vmatprep.subr.bf16.mxu0 %v1312_v57 }
  0x91   :  { %442 = vmatpush1.bf16.msra.mxu0 %v1310_v58 }
  0x92   :  { %443 = vmatprep.subr.bf16.mxu0 %v1315_v59 }
  0x95   :  { %444 = vmatpush1.bf16.msra.mxu0 %v1313_v60 }
  0x96   :  { %1205 = vmatprep.subr.bf16.mxu0 %v1505_v25 }
  0x98   :  { %462 = vmatmul.mubr.bf16.vlgmr.msra.gmra.mrb[0].mxu0 %v1316_v61 }
  0x99   :  { %1206 = vmatpush3.bf16.msra.mxu0 %v1381_v22  ;;  %1221 = vmatprep.mubr.msk.bf16.mxu0 %vm1506_vm4, %v1505_v25 }
  0x9a   :  { %1207 = vmatprep.subr.bf16.mxu0 %v1505_v25 }
 0x16b   :  { %v463_v29 = vpop.f32.mrb[0].mxu0 }
 0x16c   :  { %v1225_v30 = vadd.f32 %v463_v29, %v130_v27  ;;  %v465_v31 = vpop.f32.mrb[1].mxu0  ;;  %v1382_v27 = vld [vmem:[%s1680_s7 + $0x8] sm:$0xff]   ;;  %v543_v29 = vld [vmem:[%s1677_s4] sm:$0x3] }
 0x16d   :  { %v1226_v32 = vadd.f32 %v465_v31, %v134_v28  ;;  %v467_v33 = vpop.f32.mrb[2].mxu0  ;;  %1208 = vmatpush3.bf16.msra.mxu0 %v1382_v27  ;;  %v1383_v28 = vld [vmem:[%s1680_s7 + $0x10] sm:$0xff]   ;;  %v552_v31 = vrot.slane %v543_v29, %v133_v26  ;;  %v1386_v26 = vld [vmem:[%s1680_s7 + $0x28] sm:$0xff]  }
 0x16e   :  { %v470_v34 = vmul.f32 3.0, %v1225_v30  ;;  %v468_v35 = vpop.f32.mrb[3].mxu0  ;;  %1209 = vmatprep.subr.bf16.mxu0 %v1505_v25 }
 0x16f   :  { %v471_v36 = vmul.f32 3.0, %v1226_v32 }
 0x170   :  { %v474_v37 = vand.u32 2147483647, %v470_v34  ;;  %v472_v57 = vmax.f32 %v470_v34, 0.0  ;;  %vm505_vm2 = vcmp.gt.f32.partialorder %v470_v34, 20.0 }
 0x171   :  { %v475_v38 = vand.u32 2147483647, %v471_v36  ;;  %v473_v61 = vmax.f32 %v471_v36, 0.0  ;;  %vm506_vm3 = vcmp.gt.f32.partialorder %v471_v36, 20.0  ;;  %1210 = vmatpush3.bf16.msra.mxu0 %v1383_v28 }
 0x172   :  { %v476_v39 = vsub.f32 0.0, %v474_v37  ;;  %1211 = vmatprep.subr.bf16.mxu0 %v1505_v25 }
 0x173   :  { %v477_v40 = vsub.f32 0.0, %v475_v38 }
 0x174   :  { %v478_v41 = vmul.f32 1.442695, %v476_v39 }
 0x175   :  { %v480_v42 = vmul.f32 1.442695, %v477_v40 }
 0x176   :  { %1389 = vpow2.f32 %v478_v41 }
 0x177   :  { %1391 = vpow2.f32 %v480_v42  ;;  %v1387_v42 = vld [vmem:[%s1680_s7 + $0x30] sm:$0xff]  }
 0x180   :  { %v1390_v43 = vpop.eup %1389 }
 0x181   :  { %v1392_v44 = vpop.eup %1391  ;;  %v482_v45 = vadd.f32 1.0, %v1390_v43  ;;  %v485_v47 = vmul.f32 -0.5, %v1390_v43  ;;  %v488_v50 = vand.u32 2147483647, %v1390_v43 }
 0x182   :  { %v491_v46 = vadd.f32 1.0, %v1392_v44  ;;  %v494_v48 = vmul.f32 -0.5, %v1392_v44  ;;  %v497_v52 = vand.u32 2147483647, %v1392_v44 }
 0x183   :  { %1393 = vlog2.f32 %v482_v45  ;;  %v486_v49 = vadd.f32 1.0, %v485_v47  ;;  %vm489_vm0 = vcmp.lt.f32.partialorder %v488_v50, 0.0004427343  ;;  %v1148_v45 = vld [vmem:[%s1679_s6] ss:$0 sm:$0xff] }
 0x184   :  { %1395 = vlog2.f32 %v491_v46  ;;  %v495_v51 = vadd.f32 1.0, %v494_v48  ;;  %vm498_vm1 = vcmp.lt.f32.partialorder %v497_v52, 0.0004427343 }
 0x185   :  { %v487_v56 = vmul.f32 %v1390_v43, %v486_v49  ;;  %v1388_v43 = vld [vmem:[%s1680_s7 + $0x38] sm:$0xff]  }
 0x186   :  { %v496_v59 = vmul.f32 %v1392_v44, %v495_v51 }
 0x18d   :  { %v1394_v53 = vpop.eup %1393 }
 0x18e   :  { %v1396_v54 = vpop.eup %1395  ;;  %v484_v55 = vmul.f32 0.6931472, %v1394_v53  ;;  %v1165_v53 = vld [vmem:[%s1681_s8] ss:$0 sm:$0xff] }
 0x18f   :  { %v493_v58 = vmul.f32 0.6931472, %v1396_v54 }
 0x190   :  { %v490_v60 = vsel %vm489_vm0, %v487_v56, %v484_v55 }
 0x191   :  { %v500_v62 = vadd.f32 %v490_v60, %v472_v57  ;;  %v499_v63 = vsel %vm498_vm1, %v496_v59, %v493_v58 }
 0x192   :  { %v501_v0 = vadd.f32 %v499_v63, %v473_v61 }
 0x193   :  { %v503_v1 = vmul.f32 0.33333334, %v500_v62 }
 0x194   :  { %v504_v2 = vmul.f32 0.33333334, %v501_v0 }
 0x195   :  { %v507_v3 = vsel %vm505_vm2, %v1225_v30, %v503_v1  ;;  %v548_v30 = vrot.slane %v543_v29, %v129_v24  ;;  %v1384_v24 = vld [vmem:[%s1680_s7 + $0x18] sm:$0xff]   ;;  %s1507_s7 = smov [#allocation8]  }
 0x196   :  { %v508_v4 = vsel %vm506_vm3, %v1226_v32, %v504_v2  ;;  %v509_v7 = vpack.c.bf16 %v507_v3, %v507_v3  ;;  %1212 = vmatpush3.bf16.msra.mxu0 %v1384_v24  ;;  %s1055_s26 = sshll.u32 %s1507_s7, 4  ;;  %s1056_s26 = int_to_ptr.vmem [resolvable:$true] %s1055_s26 }
 0x197   :  { %v510_v5 = vpack.c.bf16 %v508_v4, %v508_v4  ;;  %1213 = vmatprep.subr.bf16.mxu0 %v1505_v25  ;;  %s1469_s6 = scalar_lea.vmem %s1056_s26, 128  ;;  %p1474_p11 = scmp.lt.s32.totalorder %s1056_s26, %s1056_s26 }
 0x198   :  { %p1470_p10 = scmp.ne.s32.totalorder %s1056_s26, %s1469_s6  ;;  %p1475_p12 = scmp.lt.s32.totalorder %s1469_s6, %s1469_s6 }
 0x199   :  { %747 = vmatprep.mubr.bf16.mxu1 %v510_v5 }
 0x19a   :  { %748 = vmatmul.mubr.bf16.vlgmr.msra.gmra.mrb[0].mxu1 %v509_v7  ;;  %1214 = vmatpush3.bf16.msra.mxu0 %v1385_v23  ;;  %p1476_p13 = por %p1475_p12, %p1474_p11 }
 0x19b   :  { %1175 = vmatpush3.bf16.msra.mxu1 %v1366_v6  ;;  %1215 = vmatprep.subr.bf16.mxu0 %v1505_v25 }
 0x19c   :  { %1176 = vmatprep.subr.bf16.mxu1 %v1367_v8  ;;  %p1477_p0 = pnand %p1476_p13, %p1470_p10 }
 0x19e   :  { %1216 = vmatpush3.bf16.msra.mxu0 %v1386_v26 }
 0x19f   :  { %1177 = vmatpush3.bf16.msra.mxu1 %v1368_v9  ;;  %1217 = vmatprep.subr.bf16.mxu0 %v1505_v25 }
 0x1a0   :  { %1178 = vmatprep.subr.bf16.mxu1 %v1369_v10 }
 0x1a2   :  { %1218 = vmatpush3.bf16.msra.mxu0 %v1387_v42 }
 0x1a3   :  { %1179 = vmatpush3.bf16.msra.mxu1 %v1370_v11  ;;  %1219 = vmatprep.subr.bf16.mxu0 %v1505_v25 }
 0x1a4   :  { %1180 = vmatprep.subr.bf16.mxu1 %v1371_v12 }
 0x1a6   :  { %1220 = vmatpush3.bf16.msra.mxu0 %v1388_v43 }
 0x1a7   :  { %1181 = vmatpush3.bf16.msra.mxu1 %v1372_v13 }
 0x1a8   :  { %1182 = vmatprep.subr.bf16.mxu1 %v1373_v14 }
 0x1ab   :  { %1183 = vmatpush3.bf16.msra.mxu1 %v1374_v15 }
 0x1ac   :  { %1184 = vmatprep.subr.bf16.mxu1 %v1375_v16 }
 0x1af   :  { %1185 = vmatpush3.bf16.msra.mxu1 %v1376_v17 }
 0x1b0   :  { %1186 = vmatprep.subr.bf16.mxu1 %v1377_v18 }
 0x1b3   :  { %1187 = vmatpush3.bf16.msra.mxu1 %v1378_v19 }
 0x1b4   :  { %1188 = vmatprep.subr.bf16.mxu1 %v1379_v20 }
 0x1b7   :  { %1189 = vmatpush3.bf16.msra.mxu1 %v1380_v21 }
 0x26d   :  { %v749_v32 = vpop.f32.mrb[0].mxu1 }
 0x26e   :  { %v750_v33 = vadd.f32 %v749_v32, %v548_v30  ;;  %v751_v34 = vpop.f32.mrb[1].mxu1 }
 0x26f   :  { %v752_v35 = vadd.f32 %v751_v34, %v552_v31  ;;  %v753_v36 = vpop.f32.mrb[2].mxu1 }
 0x270   :  { %1397 = vtanh.f32 %v750_v33  ;;  %v754_v37 = vpop.f32.mrb[3].mxu1 }
 0x271   :  { %1399 = vtanh.f32 %v752_v35 }
 0x27a   :  { %v1398_v38 = vpop.eup %1397 }
 0x27b   :  { %v1400_v39 = vpop.eup %1399  ;;  %v758_v41 = vpack.c.bf16 %v1398_v38, %v1398_v38 }
 0x27c   :  { %v759_v40 = vpack.c.bf16 %v1400_v39, %v1400_v39 }
 0x27e   :  { %927 = vmatprep.mubr.bf16.mxu1 %v759_v40 }
 0x27f   :  { %928 = vmatmul.mubr.bf16.vlgmr.msra.gmra.mrb[4].mxu1 %v758_v41 }
 0x352   :  { %v1190_v44 = vpop.f32.mrb[4].mxu1 }
 0x353   :  { %v1191_v46 = vpop.f32.mrb[5].mxu1 }
 0x354   :  { %v1192_v47 = vadd.f32 %v1191_v46, %v1190_v44  ;;  %v1193_v48 = vpop.f32.mrb[6].mxu1 }
 0x355   :  { %v1194_v49 = vpop.f32.mrb[7].mxu1 }
 0x356   :  { %v930_v50 = vadd.f32 %v1192_v47, %v1148_v45 }
 0x358   :  { %1401 = vtanh.f32 %v930_v50 }
 0x362   :  { %v1402_v51 = vpop.eup %1401 }
 0x363   :  { %v936_v52 = vpack.c.bf16 %v1402_v51, %v1402_v51 }
 0x365   :  { %1222 = vmatmul.mubr.bf16.vlgmr.msra.gmra.mrb[4].mxu0 %v936_v52 }
 0x438   :  { %v1042_v54 = vpop.f32.mrb[4].mxu0 }
 0x439   :  { %v1043_v55 = vadd.f32 %v1165_v53, %v1042_v54  ;;  %v1223_v56 = vpop.f32.mrb[5].mxu0 }
 0x43a   :  { %v1045_v57 = vpop.f32.mrb[6].mxu0 }
 0x43b   :  { %1048 = vst [vmem:[#allocation8] sm:$0xff] %v1043_v55  ;;  %v1224_v58 = vpop.f32.mrb[7].mxu0 }
 0x43c   :  { %1480 = shalt.err (!%p1477_p0)
}
 0x43d   :  { %s1481_s8 = scalar_lea.hbm %s1682_s9, 128 }
 0x43e   :  { %p1482_p1 = scmp.ne.s32.totalorder %s1682_s9, %s1481_s8  ;;  %p1485_p2 = scmp.lt.u32.totalorder %s1481_s8, %s1682_s9 }
 0x440   :  { %p1487_p3 = pnand %p1485_p2, %p1482_p1 }
 0x442   :  { %1490 = shalt.err (!%p1487_p3)
}
 0x443   :  { %1058 = dma.vmem_to_hbm [thread:$0]  %s1056_s26, 128, %s1682_s9, [#allocation4]  }
 0x444   :  { %1495 = dma.done.wait [#allocation4], 128  }
 0x445   :  { %1496 = vsyncadd [#allocation4], 4294967168 }
 0x446   :  { %1062 = vsyncpa [#allocation3], 1 }
 0x447   :  { %1063 = vsyncpa [#allocation6], 1 }
 0x448   :  { %1064 = vsyncpa [#allocation4], 1 }

</bundles_post_ra>
